<compile_context>
chip_gen: v6e
topology: v6e:2x2x1
jax: 0.10.0
libtpu: 0.0.40
codegen_flags: <defaults>
</compile_context>

<pallas_src>
import functools

import jax
import jax.numpy as jnp
from jax.experimental import pallas as pl
from jax.experimental.pallas import tpu as pltpu

_LANE = 128


def _split_fg_kernel(x_ref,
                     w1_ref, b1_ref,
                     w2_ref, b2_ref,
                     w3_ref, b3_ref,
                     o_ref, *, mxu_dtype):
    # x_ref: (nb, C, TP) tile — channels on sublanes, TP pixels on lanes.
    # Weights: (cout, cin) with BN scale pre-folded; biases (cout, 1) broadcast
    # along the lane (pixel) axis.  Dots accumulate in f32; operands are cast
    # to mxu_dtype (bf16 by default) on the VPU — nearly free, keeps the MXU
    # at native width so the kernel stays DMA-bound at large tiles.
    w1 = w1_ref[...].astype(mxu_dtype)
    w2 = w2_ref[...].astype(mxu_dtype)
    w3 = w3_ref[...].astype(mxu_dtype)
    b1 = b1_ref[...]
    b2 = b2_ref[...]
    b3 = b3_ref[...]

    nb = x_ref.shape[0]
    for b in range(nb):                       # static unroll; nb is small
        x = x_ref[b].astype(mxu_dtype)        # (C, TP)
        h = jnp.dot(w1, x, preferred_element_type=jnp.float32)
        h = jnp.maximum(h + b1, 0.0)
        h = jnp.dot(w2, h.astype(mxu_dtype), preferred_element_type=jnp.float32)
        h = jnp.maximum(h + b2, 0.0)
        h = jnp.dot(w3, h.astype(mxu_dtype), preferred_element_type=jnp.float32)
        h = jnp.maximum(h + b3, 0.0)
        o_ref[b] = h.astype(o_ref.dtype)


def _round_up(v, m):
    return ((v + m - 1) // m) * m


def split_fg_pallas(x_nchw, folded_params, *, tile_p=16384,
                    mxu_dtype=jnp.bfloat16):
    """x_nchw: (N, C, H, W).  Returns (N, C//16, H, W) in x's dtype.

    folded_params = (w1, b1, w2, b2, w3, b3): wN (cout, cin) conv weights with
    the eval-mode BN scale folded in, bN (cout, 1) folded BN biases.
    tile_p: target lanes (pixels) per grid step.  mxu_dtype: matmul operand
    dtype (accumulation is always f32).
    """
    N, C, H, W = x_nchw.shape
    w1, b1, w2, b2, w3, b3 = folded_params
    c1, c2, c3 = w1.shape[0], w2.shape[0], w3.shape[0]
    P = H * W

    # --- Tiling: lane-dense pixel tiles; batch-packed when pixels are few ---
    p128 = _round_up(P, _LANE)                       # one image, lane-rounded
    target = max(_LANE, _round_up(int(tile_p), _LANE))
    tp = min(target, p128)                           # lanes per image per step
    n_p = pl.cdiv(P, tp)                             # ragged last block masked

    nb = 1
    if n_p == 1 and N > 1:
        # One image doesn't fill the lane target: pack several per grid step,
        # but keep >= 2 batch blocks so both v7x TensorCores get work.
        want = min(max(1, target // tp), max(1, N // 2))
        for d in range(min(want, N), 0, -1):
            if N % d == 0:
                nb = d
                break
    n_b = N // nb
    grid = (n_b, n_p)

    # NCHW is already (N, C, H*W)-contiguous: metadata-only reshape.  No pad,
    # no dtype cast in the wrapper (that would be an extra full HBM pass);
    # f32 inputs are cast to mxu_dtype inside the kernel instead.
    x3 = x_nchw.reshape(N, C, P)

    w1f = w1.astype(jnp.float32)
    w2f = w2.astype(jnp.float32)
    w3f = w3.astype(jnp.float32)
    b1f = b1.astype(jnp.float32)
    b2f = b2.astype(jnp.float32)
    b3f = b3.astype(jnp.float32)

    in_item = jnp.dtype(x3.dtype).itemsize
    flops = 2 * N * P * (C * c1 + c1 * c2 + c2 * c3)
    bytes_accessed = (in_item * N * P * C                       # x read
                      + in_item * N * P * c3                    # out write
                      + 4 * (C * c1 + c1 * c2 + c2 * c3)        # weights
                      + 4 * (c1 + c2 + c3))                     # biases

    full = lambda bi, pi: (0, 0)
    kernel = functools.partial(_split_fg_kernel, mxu_dtype=mxu_dtype)

    out = pl.pallas_call(
        kernel,
        out_shape=jax.ShapeDtypeStruct((N, c3, P), x_nchw.dtype),
        grid_spec=pltpu.PrefetchScalarGridSpec(
            num_scalar_prefetch=0,
            grid=grid,
            in_specs=[
                pl.BlockSpec((nb, C, tp), lambda bi, pi: (bi, 0, pi)),  # x
                pl.BlockSpec((c1, C), full),                            # w1
                pl.BlockSpec((c1, 1), full),                            # b1
                pl.BlockSpec((c2, c1), full),                           # w2
                pl.BlockSpec((c2, 1), full),                            # b2
                pl.BlockSpec((c3, c2), full),                           # w3
                pl.BlockSpec((c3, 1), full),                            # b3
            ],
            out_specs=pl.BlockSpec((nb, c3, tp), lambda bi, pi: (bi, 0, pi)),
        ),
        compiler_params=pltpu.CompilerParams(
            dimension_semantics=("parallel", "parallel"),
            # Above v5e's 16 MiB scoped default (so 4 MiB double-buffered x
            # blocks + intermediates fit); below v7x's 64 MiB physical VMEM.
            vmem_limit_bytes=48 * 1024 * 1024),
        cost_estimate=pl.CostEstimate(
            flops=flops, bytes_accessed=bytes_accessed, transcendentals=0),
    )(x3, w1f, b1f, w2f, b2f, w3f, b3f)

    return out.reshape(N, c3, H, W)


def make_raw_params(key, out_channel):
    """Synthetic PyTorch-style params: (conv_w (cout,cin), gamma, beta, mean, var)."""
    C = out_channel
    dims = [(C, C // 2), (C // 2, C // 4), (C // 4, C // 16)]
    raw = []
    for cin, cout in dims:
        key, kw, kg, kb, km, kv = jax.random.split(key, 6)
        w = jax.random.normal(kw, (cout, cin), jnp.float32) * (1.0 / jnp.sqrt(cin))
        gamma = 1.0 + 0.1 * jax.random.normal(kg, (cout,), jnp.float32)
        beta = 0.1 * jax.random.normal(kb, (cout,), jnp.float32)
        mean = 0.1 * jax.random.normal(km, (cout,), jnp.float32)
        var = jnp.abs(jax.random.normal(kv, (cout,), jnp.float32)) + 0.5
        raw.append((w, gamma, beta, mean, var))
    return raw


def fold_params(raw, eps=1e-5):
    """Fold eval-mode BN into the conv weights: y = (w*s) @ x + (beta - mean*s)."""
    folded = []
    for w, gamma, beta, mean, var in raw:
        scale = gamma / jnp.sqrt(var + eps)
        w_f = w * scale[:, None]
        b_f = (beta - mean * scale)[:, None]   # (cout, 1), broadcasts over lanes
        folded += [w_f, b_f]
    return tuple(folded)


def split_fg_ref(x_nchw, raw, eps=1e-5):
    """Plain-JAX reference with PyTorch eval-mode semantics (conv1x1+BN+ReLU)x3."""
    h = x_nchw
    for w, gamma, beta, mean, var in raw:
        h = jnp.einsum('oc,nchw->nohw', w, h)
        scale = gamma / jnp.sqrt(var + eps)
        bias = beta - mean * scale
        h = h * scale[None, :, None, None] + bias[None, :, None, None]
        h = jnp.maximum(h, 0.0)
    return h


if __name__ == "__main__":
    key = jax.random.PRNGKey(0)
    kx, kp = jax.random.split(key)

    out_channel = 64          # must be divisible by 16
    N, H, W = 2, 16, 16       # small demo: x is (2, 64, 16, 16) NCHW
    x = jax.random.normal(kx, (N, out_channel, H, W), jnp.float32)

    raw_params = make_raw_params(kp, out_channel)
    folded = fold_params(raw_params)
    y_ref = split_fg_ref(x, raw_params)

    # Exact-precision path (f32 MXU operands) — tight check.
    y32 = jax.block_until_ready(
        split_fg_pallas(x, folded, mxu_dtype=jnp.float32))
    assert y32.shape == (N, out_channel // 16, H, W)
    assert jnp.allclose(y32, y_ref, atol=1e-4, rtol=1e-4)

    # Default performance path (bf16 MXU operands, f32 accumulation).
    ybf = jax.block_until_ready(split_fg_pallas(x, folded))
    assert ybf.shape == (N, out_channel // 16, H, W)
    assert jnp.allclose(ybf, y_ref, atol=1e-1, rtol=1e-1)

    print("KERNEL_OK")
</pallas_src>

<mosaic_0001>
module attributes {stable_mosaic.version = 11 : i64} {
  func.func @_split_fg_kernel(%arg0: i32, %arg1: i32, %arg2: memref<1x64x256xf32, #tpu.memory_space<vmem>>, %arg3: memref<32x64xf32, #tpu.memory_space<vmem>>, %arg4: memref<32x1xf32, #tpu.memory_space<vmem>>, %arg5: memref<16x32xf32, #tpu.memory_space<vmem>>, %arg6: memref<16x1xf32, #tpu.memory_space<vmem>>, %arg7: memref<4x16xf32, #tpu.memory_space<vmem>>, %arg8: memref<4x1xf32, #tpu.memory_space<vmem>>, %arg9: memref<1x4x256xf32, #tpu.memory_space<vmem>>) attributes {dimension_semantics = [#tpu.dimension_semantics<parallel>, #tpu.dimension_semantics<parallel>], iteration_bounds = array<i64: 2, 1>, scalar_prefetch = 0 : i64, scratch_operands = 0 : i64, tpu.core_type = #tpu.core_type<tc>, window_params = [{transform_indices = @transform_0, window_bounds = array<i64: 1, 64, 256>}, {pipeline_mode = #tpu.pipeline_mode<synchronous>, transform_indices = @transform_1, window_bounds = array<i64: 32, 64>}, {pipeline_mode = #tpu.pipeline_mode<synchronous>, transform_indices = @transform_2, window_bounds = array<i64: 32, 1>}, {pipeline_mode = #tpu.pipeline_mode<synchronous>, transform_indices = @transform_3, window_bounds = array<i64: 16, 32>}, {pipeline_mode = #tpu.pipeline_mode<synchronous>, transform_indices = @transform_4, window_bounds = array<i64: 16, 1>}, {pipeline_mode = #tpu.pipeline_mode<synchronous>, transform_indices = @transform_5, window_bounds = array<i64: 4, 16>}, {pipeline_mode = #tpu.pipeline_mode<synchronous>, transform_indices = @transform_6, window_bounds = array<i64: 4, 1>}, {transform_indices = @transform_7, window_bounds = array<i64: 1, 4, 256>}]} {
    %c0 = arith.constant 0 : index
    %c0_0 = arith.constant 0 : index
    %0 = vector.load %arg3[%c0, %c0_0] : memref<32x64xf32, #tpu.memory_space<vmem>>, vector<32x64xf32>
    %c0_1 = arith.constant 0 : index
    %c0_2 = arith.constant 0 : index
    %1 = vector.load %arg5[%c0_1, %c0_2] : memref<16x32xf32, #tpu.memory_space<vmem>>, vector<16x32xf32>
    %c0_3 = arith.constant 0 : index
    %c0_4 = arith.constant 0 : index
    %2 = vector.load %arg7[%c0_3, %c0_4] : memref<4x16xf32, #tpu.memory_space<vmem>>, vector<4x16xf32>
    %c0_5 = arith.constant 0 : index
    %c0_6 = arith.constant 0 : index
    %3 = vector.load %arg4[%c0_5, %c0_6] : memref<32x1xf32, #tpu.memory_space<vmem>>, vector<32x1xf32>
    %c0_7 = arith.constant 0 : index
    %c0_8 = arith.constant 0 : index
    %4 = vector.load %arg6[%c0_7, %c0_8] : memref<16x1xf32, #tpu.memory_space<vmem>>, vector<16x1xf32>
    %c0_9 = arith.constant 0 : index
    %c0_10 = arith.constant 0 : index
    %5 = vector.load %arg8[%c0_9, %c0_10] : memref<4x1xf32, #tpu.memory_space<vmem>>, vector<4x1xf32>
    %c0_11 = arith.constant 0 : index
    %c0_12 = arith.constant 0 : index
    %c0_13 = arith.constant 0 : index
    %6 = vector.load %arg2[%c0_11, %c0_12, %c0_13] : memref<1x64x256xf32, #tpu.memory_space<vmem>>, vector<1x64x256xf32>
    %7 = vector.shape_cast %6 : vector<1x64x256xf32> to vector<64x256xf32>
    %cst = arith.constant dense<0.000000e+00> : vector<32x256xf32>
    %8 = tpu.matmul %0, %7, %cst {dimension_numbers = #tpu.dot_dimension_numbers<[1], [0], [0], [1], [0, 0, 1, 1], [], []>} : vector<32x64xf32>, vector<64x256xf32>, vector<32x256xf32> -> vector<32x256xf32>
    %9 = vector.broadcast %3 : vector<32x1xf32> to vector<32x256xf32>
    %10 = arith.addf %8, %9 : vector<32x256xf32>
    %cst_14 = arith.constant 0.000000e+00 : f32
    %11 = vector.broadcast %cst_14 : f32 to vector<32x256xf32>
    %12 = arith.maximumf %10, %11 : vector<32x256xf32>
    %cst_15 = arith.constant dense<0.000000e+00> : vector<16x256xf32>
    %13 = tpu.matmul %1, %12, %cst_15 {dimension_numbers = #tpu.dot_dimension_numbers<[1], [0], [0], [1], [0, 0, 1, 1], [], []>} : vector<16x32xf32>, vector<32x256xf32>, vector<16x256xf32> -> vector<16x256xf32>
    %14 = vector.broadcast %4 : vector<16x1xf32> to vector<16x256xf32>
    %15 = arith.addf %13, %14 : vector<16x256xf32>
    %cst_16 = arith.constant 0.000000e+00 : f32
    %16 = vector.broadcast %cst_16 : f32 to vector<16x256xf32>
    %17 = arith.maximumf %15, %16 : vector<16x256xf32>
    %cst_17 = arith.constant dense<0.000000e+00> : vector<4x256xf32>
    %18 = tpu.matmul %2, %17, %cst_17 {dimension_numbers = #tpu.dot_dimension_numbers<[1], [0], [0], [1], [0, 0, 1, 1], [], []>} : vector<4x16xf32>, vector<16x256xf32>, vector<4x256xf32> -> vector<4x256xf32>
    %19 = vector.broadcast %5 : vector<4x1xf32> to vector<4x256xf32>
    %20 = arith.addf %18, %19 : vector<4x256xf32>
    %cst_18 = arith.constant 0.000000e+00 : f32
    %21 = vector.broadcast %cst_18 : f32 to vector<4x256xf32>
    %22 = arith.maximumf %20, %21 : vector<4x256xf32>
    %c0_19 = arith.constant 0 : index
    %c0_20 = arith.constant 0 : index
    %c0_21 = arith.constant 0 : index
    %23 = vector.load %arg9[%c0_19, %c0_20, %c0_21] : memref<1x4x256xf32, #tpu.memory_space<vmem>>, vector<1x4x256xf32>
    %24 = vector.shape_cast %23 : vector<1x4x256xf32> to vector<4x256xf32>
    %25 = vector.shape_cast %22 : vector<4x256xf32> to vector<1x4x256xf32>
    tpu.vector_store %arg9[%c0_19, %c0_20, %c0_21], %25 {strides = array<i32>} : memref<1x4x256xf32, #tpu.memory_space<vmem>>, vector<1x4x256xf32>,
    return
  }
  func.func @transform_0(%arg0: i32, %arg1: i32) -> (i32, i32, i32) {
    %c0_i32 = arith.constant 0 : i32
    %c0_i32_0 = arith.constant 0 : i32
    return %arg0, %c0_i32, %arg1 : i32, i32, i32
  }
  func.func @transform_1(%arg0: i32, %arg1: i32) -> (i32, i32) {
    %c0_i32 = arith.constant 0 : i32
    %c0_i32_0 = arith.constant 0 : i32
    %c0_i32_1 = arith.constant 0 : i32
    return %c0_i32, %c0_i32_0 : i32, i32
  }
  func.func @transform_2(%arg0: i32, %arg1: i32) -> (i32, i32) {
    %c0_i32 = arith.constant 0 : i32
    %c0_i32_0 = arith.constant 0 : i32
    %c0_i32_1 = arith.constant 0 : i32
    return %c0_i32, %c0_i32_0 : i32, i32
  }
  func.func @transform_3(%arg0: i32, %arg1: i32) -> (i32, i32) {
    %c0_i32 = arith.constant 0 : i32
    %c0_i32_0 = arith.constant 0 : i32
    %c0_i32_1 = arith.constant 0 : i32
    return %c0_i32, %c0_i32_0 : i32, i32
  }
  func.func @transform_4(%arg0: i32, %arg1: i32) -> (i32, i32) {
    %c0_i32 = arith.constant 0 : i32
    %c0_i32_0 = arith.constant 0 : i32
    %c0_i32_1 = arith.constant 0 : i32
    return %c0_i32, %c0_i32_0 : i32, i32
  }
  func.func @transform_5(%arg0: i32, %arg1: i32) -> (i32, i32) {
    %c0_i32 = arith.constant 0 : i32
    %c0_i32_0 = arith.constant 0 : i32
    %c0_i32_1 = arith.constant 0 : i32
    return %c0_i32, %c0_i32_0 : i32, i32
  }
  func.func @transform_6(%arg0: i32, %arg1: i32) -> (i32, i32) {
    %c0_i32 = arith.constant 0 : i32
    %c0_i32_0 = arith.constant 0 : i32
    %c0_i32_1 = arith.constant 0 : i32
    return %c0_i32, %c0_i32_0 : i32, i32
  }
  func.func @transform_7(%arg0: i32, %arg1: i32) -> (i32, i32, i32) {
    %c0_i32 = arith.constant 0 : i32
    %c0_i32_0 = arith.constant 0 : i32
    return %arg0, %c0_i32, %arg1 : i32, i32, i32
  }
}

</mosaic_0001>

<bundles_post_ra>
// kernel: tpu_custom_call.1
= control target key start
LH: loop header
LB: loop body
LE: loop exit
PB: predicated region body
PF: predicated region fallthrough
CT: control target
= control target key end

     0   :  { %12 = vsyncpa [#allocation3], 0  ;;  %s1215_s0 = inlined_call_operand.hbm [shape: f32[2,64,256], index: 0, kind: input, shape index: {}]   ;;  %s1216_s1 = inlined_call_operand.vmem [shape: f32[32,64], index: 1, kind: input, shape index: {}]   ;;  %s1217_s2 = inlined_call_operand.vmem [shape: f32[32,1], index: 2, kind: input, shape index: {}]   ;;  %s1218_s3 = inlined_call_operand.vmem [shape: f32[16,32], index: 3, kind: input, shape index: {}]   ;;  %s1219_s4 = inlined_call_operand.vmem [shape: f32[16,1], index: 4, kind: input, shape index: {}]   ;;  %s1220_s5 = inlined_call_operand.vmem [shape: f32[4,16], index: 5, kind: input, shape index: {}]   ;;  %s1221_s6 = inlined_call_operand.vmem [shape: f32[4,1], index: 6, kind: input, shape index: {}]   ;;  %s1222_s7 = inlined_call_operand.hbm [shape: f32[2,4,256], index: 7, kind: output, shape index: {}]  }
   0x1   :  { %14 = vsyncpa [#allocation3 + $0x1], 0 }
   0x2   :  { %15 = vsyncpa [#allocation4], 0 }
   0x3   :  { %17 = vsyncpa [#allocation4 + $0x1], 0  ;;  %s1011_s24 = smov 0   ;;  %s1013_s25 = smov 0  }
   0x4   :  { %s1015_s26 = smov 0   ;;  %s1017_s27 = smov 0  }
   0x5   :  { %s1019_s28 = smov 0   ;;  %s1021_s29 = smov 0  }
   0x6 LB: > { %s763_s30 = sadd.s32 4294967295, %s963_s29   ;;  %s764_s8 = sadd.s32 4294967294, %s963_s29   ;;  %s963_s29 = sphi %s1021_s29, %s23_s29   ;;  %s959_s28 = sphi %s1019_s28, %s1236_s28   ;;  %s955_s27 = sphi %s1017_s27, %s1235_s27   ;;  %s951_s26 = sphi %s1015_s26, %s1234_s26   ;;  %s947_s25 = sphi %s1013_s25, %s1233_s25   ;;  %s943_s24 = sphi %s1011_s24, %s1232_s24  }
   0x7   : > { %s35_s9 = sadd.s32 1, %s959_s28  ;;  %s44_s10 = sadd.s32 1, %s951_s26 }
   0x8   : > { %p37_p0 = scmp.ge.s32.totalorder %s35_s9, 2  ;;  %p51_p1 = scmp.ne.s32.totalorder %s951_s26, %s947_s25 }
   0x9   : > { %p52_p2 = scmp.eq.s32.totalorder %s963_s29, 0  ;;  %p57_p3 = scmp.ne.s32.totalorder %s947_s25, %s943_s24 }
   0xa   : > { %s1238_s9 = smov (%p37_p0, %s35_s9), 0  ;;  %p58_p5 = scmp.eq.s32.totalorder %s763_s30, 0 }
   0xb   : > { %1224 = sst [smem:[#allocation8_spill]] %s1238_s9  ;;  %p1052_p4 = por %p52_p2, %p51_p1 }
   0xc   : > { %s39_s12 = ssub.s32 %s959_s28, %s1238_s9  ;;  %p209_p6 = scmp.eq.s32.totalorder %s763_s30, 1 }
   0xd   : > { %p42_p7 = scmp.eq.s32.totalorder %s39_s12, 0  ;;  %p1058_p8 = por %p58_p5, %p57_p3 }
   0xe   : > { %p1062_p9 = por %p209_p6, %p51_p1  ;;  %p215_p10 = scmp.eq.s32.totalorder %s764_s8, 1 }
   0xf   : > { %s1067_s15 = scalar_select %p42_p7, %s951_s26, %s44_s10  }
  0x10   : > { %p1069_p11 = por %p215_p10, %p57_p3  ;;  %p799_p13 = scmp.lt.s32.totalorder %s963_s29, 2 }
  0x11   : > { %s253_s17 = sand.u32 1, %s951_s26   ;;  %s785_s19 = sshll.u32 %s959_s28, 11 }
  0x12   : > { %s767_s18 = sshll.u32 %s253_s17, 7  ;;  %s265_s22 = scalar_lea.hbm %s1215_s0, %s785_s19 }
  0x13   : > { %s257_s23 = scalar_lea.vmem [#allocation2], %s767_s18  ;;  %p1082_p0 = pnand %p799_p13, %p1052_p4 }
  0x14   : > { %s266_s30 = sshll.u32 %s257_s23, 4  ;;  %p770_p1 = scmp.ge.s32.totalorder %s963_s29, 1  ;;  %s267_s30 = int_to_ptr.vmem [resolvable:$true] %s266_s30 }
  0x15   : > { %s254_s10 = scalar_lea.sflag [#allocation3], %s253_s17  ;;  %p857_p2 = pneg %p1082_p0 }
  0x16   : > { %s868_s12 = scalar_lea.vmem %s267_s30, 2048  ;;  %s965_s9 = smov [#allocation2]  }
  0x17   : > { %p869_p3 = scmp.ne.s32.totalorder %s267_s30, %s868_s12  ;;  %s873_s20 = sshll.u32 %s965_s9, 4  ;;  %s874_s20 = int_to_ptr.vmem [resolvable:$false] %s873_s20 }
  0x18   : > { %s875_s18 = scalar_lea.vmem %s874_s20, 4096  ;;  %p876_p7 = scmp.lt.s32.totalorder %s267_s30, %s874_s20 }
  0x19   : > { %p871_p5 = pnand %p869_p3, %p857_p2  ;;  %p877_p10 = scmp.lt.s32.totalorder %s875_s18, %s868_s12 }
  0x1b   : > { %p872_p6 = pneg %p871_p5  ;;  %p878_p12 = por %p877_p10, %p876_p7 }
  0x1d   : > { %p879_p4 = pnand %p878_p12, %p872_p6 }
  0x1f   : > { %882 = shalt.err (!%p879_p4)
}
  0x20   : > { %s966_s11 = smov 256   ;;  %s967_s17 = smov 16  }
  0x21   : > { %794 = dma.hbm_to_vmem [thread:$0]  (!%p1082_p0), %s265_s22, 2048, %s267_s30, %s254_s10, %s966_s11, %s966_s11, %s967_s17  }
  0x22   : > { %p274_p13 = scmp.lt.s32.totalorder %s963_s29, 3 }
  0x24   : > { %p275_p2 = pnand %p770_p1, %p274_p13 }
  0x25   : > { %s1095_s9 = sand.u32 (!%p275_p2), 1, %s947_s25  }
  0x26   : > { %278 = sbr.rel (%p275_p2) target bundleno = 703 (0x2bf), region = 48  ;;  %s771_s19 = sshll.u32 (!%p275_p2), %s1095_s9, 7 }
  0x27   : > { %s281_s21 = scalar_lea.sflag (!%p275_p2), [#allocation3], %s1095_s9  ;;  %s1099_s23 = scalar_lea.vmem (!%p275_p2), [#allocation2], %s771_s19 }
  0x2b   : > { %934 = dma.done.wait (%p1058_p8), %s281_s21, 2048  }
  0x2c   : > { %936 = vsyncadd (%p1058_p8), %s281_s21, 4294965248  ;;  %v968_v0 = vmov 0.0   ;;  %v969_v1 = vmov 0   ;;  %v346_v2 = vld [vmem:[%s1099_s23 + $0x78] sm:$0xff]  ;;  %v345_v3 = vld [vmem:[%s1099_s23 + $0x70] sm:$0xff]  ;;  %vm367_vm0 = vcmask 523264  }
  0x2d   : > { %444 = vmatprep.mubr.f32.mxu0 %v968_v0  ;;  %854 = vset.pattern.permute.xlu1 %v969_v1  ;;  %v344_v4 = vld [vmem:[%s1099_s23 + $0x68] sm:$0xff]  ;;  %v343_v5 = vld [vmem:[%s1099_s23 + $0x60] sm:$0xff]  ;;  %v342_v6 = vld [vmem:[%s1099_s23 + $0x58] sm:$0xff]  ;;  %vm487_vm1 = vcmask 261120   ;;  %vm580_vm2 = vcmask 130048   ;;  %s772_s8 = sshll.u32 %s1095_s9, 3 }
  0x2e   : > { %853 = vset.pattern.permute.xlu0 %v969_v1  ;;  %558 = vmatprep.mubr.f32.mxu1 %v968_v0  ;;  %v341_v7 = vld [vmem:[%s1099_s23 + $0x50] sm:$0xff]  ;;  %v340_v8 = vld [vmem:[%s1099_s23 + $0x48] sm:$0xff]  ;;  %v339_v9 = vld [vmem:[%s1099_s23 + $0x40] sm:$0xff]  ;;  %s314_s10 = scalar_lea.vmem [#allocation5], %s772_s8  ;;  %s663_s17 = scalar_lea.sflag [#allocation4], %s1095_s9 }
  0x2f   : > { %396 = vmatprep.subr.mxu0 %v346_v2  ;;  %v338_v10 = vld [vmem:[%s1099_s23 + $0x38] sm:$0xff]  ;;  %v325_v11 = vld [vmem:[%s1217_s2 + $0x8] sm:$0xff]  ;;  %v337_v12 = vld [vmem:[%s1099_s23 + $0x30] sm:$0xff]  ;;  %s679_s12 = sshll.u32 %s314_s10, 4  ;;  %s970_s21 = smov [#allocation5]   ;;  %s680_s12 = int_to_ptr.vmem [resolvable:$true] %s679_s12 }
  0x30   : > { %397 = vmatpush1.msra.mxu0 %v345_v3  ;;  %354 = vperm.xlu1 %854, %v325_v11   ;;  %v327_v13 = vld [vmem:[%s1217_s2 + $0x18] sm:$0xff]  ;;  %v336_v14 = vld [vmem:[%s1099_s23 + $0x28] sm:$0xff]  ;;  %v324_v15 = vld [vmem:[%s1217_s2] sm:$0xff]  ;;  %s883_s19 = scalar_lea.vmem %s680_s12, 128  ;;  %s887_s13 = sshll.u32 %s970_s21, 4  ;;  %s888_s13 = int_to_ptr.vmem [resolvable:$false] %s887_s13 }
  0x31   : > { %398 = vmatprep.subr.mxu0 %v344_v4  ;;  %364 = vperm.xlu0 %853, %v327_v13   ;;  %v335_v16 = vld [vmem:[%s1099_s23 + $0x20] sm:$0xff]  ;;  %v326_v17 = vld [vmem:[%s1217_s2 + $0x10] sm:$0xff]  ;;  %v334_v18 = vld [vmem:[%s1099_s23 + $0x18] sm:$0xff]  ;;  %p884_p8 = scmp.ne.s32.totalorder %s680_s12, %s883_s19  ;;  %p890_p1 = scmp.lt.s32.totalorder %s680_s12, %s888_s13 }
  0x32   : > { %399 = vmatpush1.msra.mxu0 %v343_v5  ;;  %v333_v19 = vld [vmem:[%s1099_s23 + $0x10] sm:$0xff]  ;;  %v332_v20 = vld [vmem:[%s1099_s23 + $0x8] sm:$0xff]  ;;  %v328_v21 = vld [vmem:[%s1219_s4] sm:$0xff] }
  0x33   : > { %400 = vmatprep.subr.mxu0 %v342_v6  ;;  %v331_v22 = vld [vmem:[%s1099_s23] sm:$0xff]  ;;  %v329_v23 = vld [vmem:[%s1219_s4 + $0x8] sm:$0xff]  ;;  %v319_v27 = vld [vmem:[%s1216_s1 + $0x10] sm:$0xff]  ;;  %s786_s23 = sshll.u32 %s955_s27, 7  ;;  %p885_p12 = pnand %p884_p8, %p1062_p9 }
  0x34   : > { %401 = vmatpush1.msra.mxu0 %v341_v7  ;;  %349 = vperm.xlu1 %854, %v324_v15   ;;  %v317_v24 = vld [vmem:[%s1216_s1] sm:$0xff]  ;;  %v318_v26 = vld [vmem:[%s1216_s1 + $0x8] sm:$0xff]  ;;  %v320_v28 = vld [vmem:[%s1216_s1 + $0x18] sm:$0xff]  ;;  %s677_s11 = scalar_lea.hbm %s1222_s7, %s786_s23  ;;  %s889_s27 = scalar_lea.vmem %s888_s13, 256 }
  0x35   : > { %402 = vmatprep.subr.mxu0 %v340_v8  ;;  %359 = vperm.xlu0 %853, %v326_v17   ;;  %v330_v25 = vld [vmem:[%s1221_s6] sm:$0xf]  ;;  %v322_v58 = vld [vmem:[%s1218_s3 + $0x8] sm:$0xff]  ;;  %p886_p0 = pneg %p885_p12  ;;  %p891_p3 = scmp.lt.s32.totalorder %s889_s27, %s883_s19 }
  0x36   : > { %403 = vmatpush1.msra.mxu0 %v339_v9  ;;  %v321_v57 = vld [vmem:[%s1218_s3] sm:$0xff] }
  0x37   : > { %404 = vmatprep.subr.mxu0 %v338_v10  ;;  %p892_p5 = por %p891_p3, %p890_p1 }
  0x38   : > { %405 = vmatpush1.msra.mxu0 %v337_v12  ;;  %479 = vperm.xlu1 %854, %v328_v21  }
  0x39   : > { %406 = vmatprep.subr.mxu0 %v336_v14  ;;  %484 = vperm.xlu0 %853, %v329_v23   ;;  %p893_p6 = pnand %p892_p5, %p886_p0 }
  0x3a   : > { %407 = vmatpush1.msra.mxu0 %v335_v16 }
  0x3b   : > { %408 = vmatprep.subr.mxu0 %v334_v18 }
  0x3c   : > { %409 = vmatpush1.msra.mxu0 %v333_v19 }
  0x3d   : > { %410 = vmatprep.subr.mxu0 %v332_v20  ;;  %577 = vperm.xlu0 %853, %v330_v25  }
  0x3e   : > { %411 = vmatpush1.msra.mxu0 %v331_v22 }
  0x3f   : > { %773 = vmatmul.mubr.msk.f32.vlgmr.msra.gmra.mxu0 %vm367_vm0, %v317_v24 }
  0x40   : > { %450 = vmatprep.mubr.f32.mxu0 %v968_v0 }
  0x43   : > { %774 = vmatmul.mubr.msk.f32.gmra.mxu0 %vm367_vm0, %v318_v26 }
  0x44   : > { %456 = vmatprep.mubr.f32.mxu0 %v968_v0 }
  0x47   : > { %775 = vmatmul.mubr.msk.f32.gmra.mxu0 %vm367_vm0, %v319_v27 }
  0x48   : > { %462 = vmatprep.mubr.f32.mxu0 %v968_v0 }
  0x4b   : > { %776 = vmatmul.mubr.msk.f32.gmra.mxu0 %vm367_vm0, %v320_v28 }
  0xab   : > { %v355_v36 = vpop.permute.xlu1 %354 }
  0xac   : > { %v365_v33 = vpop.permute.xlu0 %364 }
  0xaf   : > { %v350_v44 = vpop.permute.xlu1 %349 }
  0xb0   : > { %v360_v38 = vpop.permute.xlu0 %359 }
  0xb3   : > { %v480_v63 = vpop.permute.xlu1 %479 }
  0xb4   : > { %v485_v62 = vpop.permute.xlu0 %484 }
  0xb8   : > { %v578_v10 = vpop.permute.xlu0 %577 }
  0xff   : > { %v446_v29 = vpop.f32.mrf.mxu0 }
 0x100   : > { %v447_v51 = vadd.f32 %v446_v29, %v350_v44 }
 0x101   : > { %v448_v30 = vpop.f32.mrf.mxu0 }
 0x102   : > { %v449_v49 = vadd.f32 %v448_v30, %v350_v44  ;;  %v469_v56 = vmax.f32 %v447_v51, 0.0 }
 0x103   : > { %v452_v31 = vpop.f32.mrf.mxu0 }
 0x104   : > { %v453_v47 = vadd.f32 %v452_v31, %v355_v36  ;;  %v470_v55 = vmax.f32 %v449_v49, 0.0 }
 0x105   : > { %v454_v32 = vpop.f32.mrf.mxu0 }
 0x106   : > { %v455_v45 = vadd.f32 %v454_v32, %v355_v36  ;;  %v471_v54 = vmax.f32 %v453_v47, 0.0 }
 0x107   : > { %v458_v34 = vpop.f32.mrf.mxu0 }
 0x108   : > { %v459_v43 = vadd.f32 %v458_v34, %v360_v38  ;;  %v472_v53 = vmax.f32 %v455_v45, 0.0 }
 0x109   : > { %v460_v35 = vpop.f32.mrf.mxu0 }
 0x10a   : > { %v461_v41 = vadd.f32 %v460_v35, %v360_v38  ;;  %v473_v52 = vmax.f32 %v459_v43, 0.0 }
 0x10b   : > { %v464_v37 = vpop.f32.mrf.mxu0 }
 0x10c   : > { %v465_v39 = vadd.f32 %v464_v37, %v365_v33  ;;  %v474_v50 = vmax.f32 %v461_v41, 0.0 }
 0x10d   : > { %v466_v40 = vpop.f32.mrf.mxu0 }
 0x10e   : > { %v467_v42 = vadd.f32 %v466_v40, %v365_v33  ;;  %v475_v48 = vmax.f32 %v465_v39, 0.0 }
 0x110   : > { %v476_v46 = vmax.f32 %v467_v42, 0.0 }
 0x112   : > { %518 = vmatprep.subr.mxu1 %v476_v46 }
 0x113   : > { %519 = vmatpush1.msra.mxu1 %v475_v48 }
 0x114   : > { %520 = vmatprep.subr.mxu1 %v474_v50 }
 0x115   : > { %521 = vmatpush1.msra.mxu1 %v473_v52 }
 0x116   : > { %522 = vmatprep.subr.mxu1 %v472_v53 }
 0x117   : > { %523 = vmatpush1.msra.mxu1 %v471_v54 }
 0x118   : > { %524 = vmatprep.subr.mxu1 %v470_v55 }
 0x119   : > { %525 = vmatpush1.msra.mxu1 %v469_v56 }
 0x11a   : > { %777 = vmatmul.mubr.msk.f32.vlgmr.msra.gmra.mxu1 %vm487_vm1, %v321_v57 }
 0x11b   : > { %564 = vmatprep.mubr.f32.mxu1 %v968_v0 }
 0x11e   : > { %778 = vmatmul.mubr.msk.f32.gmra.mxu1 %vm487_vm1, %v322_v58 }
 0x11f   : > { %648 = vmatprep.mubr.f32.mxu1 %v968_v0  ;;  %v323_v0 = vld [vmem:[%s1220_s5] sm:$0xf] }
 0x1da   : > { %v560_v59 = vpop.f32.mrf.mxu1 }
 0x1db   : > { %v561_v5 = vadd.f32 %v560_v59, %v480_v63 }
 0x1dc   : > { %v562_v60 = vpop.f32.mrf.mxu1 }
 0x1dd   : > { %v563_v3 = vadd.f32 %v562_v60, %v480_v63  ;;  %v571_v9 = vmax.f32 %v561_v5, 0.0 }
 0x1de   : > { %v566_v61 = vpop.f32.mrf.mxu1 }
 0x1df   : > { %v567_v1 = vadd.f32 %v566_v61, %v485_v62  ;;  %v572_v8 = vmax.f32 %v563_v3, 0.0 }
 0x1e0   : > { %v568_v2 = vpop.f32.mrf.mxu1 }
 0x1e1   : > { %v569_v4 = vadd.f32 %v568_v2, %v485_v62  ;;  %v573_v7 = vmax.f32 %v567_v1, 0.0 }
 0x1e3   : > { %v574_v6 = vmax.f32 %v569_v4, 0.0 }
 0x1e5   : > { %612 = vmatprep.subr.mxu1 %v574_v6 }
 0x1e6   : > { %613 = vmatpush1.msra.mxu1 %v573_v7 }
 0x1e7   : > { %614 = vmatprep.subr.mxu1 %v572_v8 }
 0x1e8   : > { %615 = vmatpush1.msra.mxu1 %v571_v9 }
 0x1e9   : > { %779 = vmatmul.mubr.msk.f32.vlgmr.msra.gmra.mxu1 %vm580_vm2, %v323_v0 }
 0x2a9   : > { %v650_v11 = vpop.f32.mrf.mxu1 }
 0x2aa   : > { %v651_v12 = vadd.f32 %v650_v11, %v578_v10 }
 0x2ab   : > { %v652_v13 = vpop.f32.mrf.mxu1 }
 0x2ac   : > { %v653_v14 = vadd.f32 %v652_v13, %v578_v10  ;;  %v655_v15 = vmax.f32 %v651_v12, 0.0 }
 0x2ae   : > { %v656_v16 = vmax.f32 %v653_v14, 0.0 }
 0x2b0   : > { %v659_v17 = vcombine.low %v655_v15, %v656_v16 }
 0x2b2   : > { %661 = vst [vmem:[%s314_s10] sm:$0xff] %v659_v17 }
 0x2b3   : > { %896 = shalt.err (!%p893_p6)
}
 0x2b4   : > { %s897_s22 = scalar_lea.hbm %s677_s11, 128  ;;  %s901_s8 = scalar_lea.hbm %s1222_s7, 256 }
 0x2b5   : > { %p898_p7 = scmp.ne.s32.totalorder %s677_s11, %s897_s22  ;;  %p902_p13 = scmp.lt.s32.totalorder %s677_s11, %s1222_s7 }
 0x2b6   : > { %p903_p2 = scmp.lt.s32.totalorder %s901_s8, %s897_s22 }
 0x2b7   : > { %p899_p10 = pnand %p898_p7, %p1062_p9 }
 0x2b8   : > { %p904_p8 = por %p903_p2, %p902_p13 }
 0x2b9   : > { %p900_p4 = pneg %p899_p10 }
 0x2bb   : > { %p905_p12 = pnand %p904_p8, %p900_p4 }
 0x2bd   : > { %908 = shalt.err (!%p905_p12)
}
 0x2be   : > { %789 = dma.vmem_to_hbm [thread:$0]  (%p1062_p9), %s680_s12, 128, %s677_s11, %s663_s17  }
 0x2bf PF: > { %s691_s20 = sand.u32 1, %s943_s24   ;;  %p1230_p0 = scmp.ge.s32.totalorder %s963_s29, 2 }
 0x2c0   : > { %s692_s18 = scalar_lea.sflag [#allocation4], %s691_s20 }
 0x2c1   : > { %p796_p1 = pnand %p1230_p0, %p1069_p11 }
 0x2c3   : > { %p797_p3 = pneg %p796_p1 }
 0x2c5   : > { %938 = dma.done.wait (%p797_p3), %s692_s18, 128  }
 0x2c6   : > { %940 = vsyncadd (%p797_p3), %s692_s18, 4294967168  ;;  %s23_s29 = sadd.s32 1, %s963_s29   ;;  %s1231_s14 = sld [smem:[#allocation8_spill]] }
 0x2c7   : > { %p20_p5 = scmp.ge.s32.totalorder %s23_s29, 4   ;;  %s1232_s24 = smov %s947_s25 }
 0x2c8   : > { %s1233_s25 = smov %s951_s26  ;;  %s1234_s26 = smov %s1067_s15 }
 0x2c9   : > { %s1235_s27 = smov %s959_s28  ;;  %22 = sbr.rel (!%p20_p5) target bundleno = 6 (0x6), region = 93 }
 0x2cc   : > { %s1236_s28 = smov %s1231_s14 }
 0x2ce   :  { %697 = vsyncpa [#allocation3], 1 }
 0x2cf   :  { %699 = vsyncpa [#allocation3 + $0x1], 1 }
 0x2d0   :  { %700 = vsyncpa [#allocation4], 1 }
 0x2d1   :  { %702 = vsyncpa [#allocation4 + $0x1], 1 }

</bundles_post_ra>
